<compile_context>
chip_gen: v7x
topology: tpu7x:2x2x1
jax: 0.10.0
libtpu: 0.0.40
codegen_flags: <defaults>
</compile_context>

<pallas_src>
import jax
import jax.numpy as jnp
from jax import lax
from jax.experimental import pallas as pl
from jax.experimental.pallas import tpu as pltpu


def _basic_block_kernel(x_ref, t1_ref, t2_ref, b1_ref, b2_ref, o_ref, acc_ref):
    """Fused conv3x3 + BN + ReLU + conv3x3 + BN + residual + ReLU.

    x_ref  : (NB, H, W*Cin)   f32 input block, lane-dense; also the residual
    t*_ref : (3, W*Cin, W*Cout) bf16 block-banded per-kh conv taps (BN scale folded)
    b*_ref : (1, W*Cout)      f32 folded BN bias (tiled over W)
    o_ref  : (NB, H, W*Cout)  f32 output block
    acc_ref: VMEM scratch (NB, H, W*Cout) f32 accumulator
    """
    NB, H, _ = x_ref.shape
    WCo = o_ref.shape[-1]

    x = x_ref[...]                                   # f32, reused for residual

    def conv_banded(act_bf16, taps_ref):
        # taps_ref[kh] folds the 3 kw taps + W zero-padding + BN scale.
        # Row (kh) offsets become shifted adds into the accumulator.
        rows = act_bf16.reshape(NB * H, act_bf16.shape[-1])
        p = jnp.dot(rows, taps_ref[1], preferred_element_type=jnp.float32)
        acc_ref[...] = p.reshape(NB, H, WCo)                        # kh=1 (dh= 0)
        p = jnp.dot(rows, taps_ref[0], preferred_element_type=jnp.float32)
        acc_ref[:, 1:, :] += p.reshape(NB, H, WCo)[:, :H - 1, :]    # kh=0 (dh=-1)
        p = jnp.dot(rows, taps_ref[2], preferred_element_type=jnp.float32)
        acc_ref[:, :H - 1, :] += p.reshape(NB, H, WCo)[:, 1:, :]    # kh=2 (dh=+1)
        return acc_ref[...]

    # conv1 -> bn1 -> relu   (bf16 MXU matmuls, f32 accumulate, f32 epilogue)
    h1 = conv_banded(x.astype(jnp.bfloat16), t1_ref)
    h1 = jnp.maximum(h1 + b1_ref[...], 0.0)

    # conv2 -> bn2 -> +identity -> relu
    h2 = conv_banded(h1.astype(jnp.bfloat16), t2_ref)
    o_ref[...] = jnp.maximum(h2 + b2_ref[...] + x, 0.0).astype(o_ref.dtype)


def _fold_bn(bn, eps=1e-5):
    gamma, beta, mean, var = bn
    scale = gamma.astype(jnp.float32) / jnp.sqrt(var.astype(jnp.float32) + eps)
    bias = beta.astype(jnp.float32) - mean.astype(jnp.float32) * scale
    return scale, bias


def _banded_taps(w, width, out_scale):
    """torch conv weight (O, I, 3, 3) -> (3, width*I, width*O) banded matrices.

    Row index = wi*I + i, column index = wo*O + o; entry nonzero iff
    wi == wo + (kw-1), value = w[o, i, kh, kw] * out_scale[o].  The band
    structure implements both the kw taps and zero-padding along W.
    """
    O, I = int(w.shape[0]), int(w.shape[1])
    wf = w.astype(jnp.float32) * out_scale[:, None, None, None]   # fold BN scale
    taps = []
    for kh in range(3):
        t = jnp.zeros((width * I, width * O), jnp.float32)
        for kw in range(3):
            dw = kw - 1
            band = jnp.eye(width, width, k=-dw, dtype=jnp.float32)  # band[wi,wo]=1 iff wi==wo+dw
            blk = wf[:, :, kh, kw].T                                 # (I, O)
            t = t + (band[:, None, :, None] * blk[None, :, None, :]
                     ).reshape(width * I, width * O)
        taps.append(t)
    return jnp.stack(taps, axis=0)


def basic_block_forward(x_nchw, params, *, block_n=1):
    """BasicBlock forward. x_nchw: (N, C, H, W) float32 (PyTorch layout)."""
    x = jnp.transpose(x_nchw, (0, 2, 3, 1)).astype(jnp.float32)   # NHWC
    N, H, W, Cin = x.shape
    Cout = int(params["w1"].shape[0])
    if Cin != Cout:
        raise NotImplementedError("default path requires inplanes == planes")
    WCi, WCo = W * Cin, W * Cout

    s1, b1 = _fold_bn(params["bn1"])
    s2, b2 = _fold_bn(params["bn2"])
    t1 = _banded_taps(params["w1"], W, s1).astype(jnp.bfloat16)   # (3, WCi, WCo)
    t2 = _banded_taps(params["w2"], W, s2).astype(jnp.bfloat16)   # (3, WCo, WCo)
    b1t = jnp.tile(b1, W).reshape(1, WCo)
    b2t = jnp.tile(b2, W).reshape(1, WCo)

    x_flat = x.reshape(N, H, WCi)        # lane-dense: W and C merged on lanes

    flops = 2 * 3 * 2 * N * H * WCi * WCo
    bytes_accessed = int(4 * x_flat.size + 2 * t1.size + 2 * t2.size +
                         4 * b1t.size + 4 * b2t.size + 4 * N * H * WCo)

    out_flat = pl.pallas_call(
        _basic_block_kernel,
        out_shape=jax.ShapeDtypeStruct((N, H, WCo), jnp.float32),
        grid_spec=pltpu.PrefetchScalarGridSpec(
            num_scalar_prefetch=0,
            grid=(pl.cdiv(N, block_n),),
            in_specs=[
                pl.BlockSpec((block_n, H, WCi), lambda n: (n, 0, 0)),
                pl.BlockSpec((3, WCi, WCo), lambda n: (0, 0, 0)),
                pl.BlockSpec((3, WCo, WCo), lambda n: (0, 0, 0)),
                pl.BlockSpec((1, WCo), lambda n: (0, 0)),
                pl.BlockSpec((1, WCo), lambda n: (0, 0)),
            ],
            out_specs=pl.BlockSpec((block_n, H, WCo), lambda n: (n, 0, 0)),
            scratch_shapes=[pltpu.VMEM((block_n, H, WCo), jnp.float32)],
        ),
        compiler_params=pltpu.CompilerParams(
            dimension_semantics=("parallel",),
        ),
        cost_estimate=pl.CostEstimate(
            flops=flops, transcendentals=0, bytes_accessed=bytes_accessed),
    )(x_flat, t1, t2, b1t, b2t)

    out = out_flat.reshape(N, H, W, Cout)
    return jnp.transpose(out, (0, 3, 1, 2))          # back to NCHW


def basic_block_reference(x_nchw, params):
    """Pure-JAX reference (XLA conv, f32 HIGHEST) for validation."""
    x = jnp.transpose(x_nchw, (0, 2, 3, 1)).astype(jnp.float32)

    def conv(h, w):
        w_hwio = jnp.transpose(w, (2, 3, 1, 0))
        return lax.conv_general_dilated(
            h, w_hwio, window_strides=(1, 1), padding="SAME",
            dimension_numbers=("NHWC", "HWIO", "NHWC"),
            precision=lax.Precision.HIGHEST)

    def bn(h, gamma, beta, mean, var, eps=1e-5):
        return (h - mean) / jnp.sqrt(var + eps) * gamma + beta

    out = jax.nn.relu(bn(conv(x, params["w1"]), *params["bn1"]))
    out = bn(conv(out, params["w2"]), *params["bn2"])
    out = jax.nn.relu(out + x)
    return jnp.transpose(out, (0, 3, 1, 2))


if __name__ == "__main__":
    # inplanes = planes = 8, stride = 1, downsample = None; W*C = 128 (lane-dense)
    N, C, H, W = 2, 8, 16, 16
    key = jax.random.PRNGKey(0)
    ks = jax.random.split(key, 11)

    x = jax.random.normal(ks[0], (N, C, H, W), jnp.float32)
    params = {
        # conv3x3 weights, torch layout (out, in, 3, 3), no bias
        "w1": 0.2 * jax.random.normal(ks[1], (C, C, 3, 3), jnp.float32),
        "w2": 0.2 * jax.random.normal(ks[2], (C, C, 3, 3), jnp.float32),
        # BatchNorm params: (gamma, beta, running_mean, running_var)
        "bn1": (jax.random.uniform(ks[3], (C,), minval=0.5, maxval=1.5),
                0.1 * jax.random.normal(ks[4], (C,)),
                0.1 * jax.random.normal(ks[5], (C,)),
                jax.random.uniform(ks[6], (C,), minval=0.5, maxval=1.5)),
        "bn2": (jax.random.uniform(ks[7], (C,), minval=0.5, maxval=1.5),
                0.1 * jax.random.normal(ks[8], (C,)),
                0.1 * jax.random.normal(ks[9], (C,)),
                jax.random.uniform(ks[10], (C,), minval=0.5, maxval=1.5)),
    }

    out = jax.block_until_ready(basic_block_forward(x, params))
    ref = jax.block_until_ready(basic_block_reference(x, params))

    assert out.shape == (N, C, H, W)
    # bf16 matmuls vs f32-HIGHEST reference -> allow small numerical slack.
    if not jnp.allclose(out, ref, atol=1e-1, rtol=5e-2):
        raise AssertionError("Pallas kernel output mismatch vs JAX reference")
    print("KERNEL_OK")
</pallas_src>

<mosaic_0001>
module attributes {stable_mosaic.version = 11 : i64} {
  func.func @_basic_block_kernel(%arg0: i32, %arg1: memref<1x16x128xf32, #tpu.memory_space<vmem>>, %arg2: memref<3x128x128xbf16, #tpu.memory_space<vmem>>, %arg3: memref<3x128x128xbf16, #tpu.memory_space<vmem>>, %arg4: memref<1x128xf32, #tpu.memory_space<vmem>>, %arg5: memref<1x128xf32, #tpu.memory_space<vmem>>, %arg6: memref<1x16x128xf32, #tpu.memory_space<vmem>>, %arg7: memref<1x16x128xf32, #tpu.memory_space<vmem>>) attributes {dimension_semantics = [#tpu.dimension_semantics<parallel>], iteration_bounds = array<i64: 2>, scalar_prefetch = 0 : i64, scratch_operands = 1 : i64, tpu.core_type = #tpu.core_type<tc>, window_params = [{transform_indices = @transform_0, window_bounds = array<i64: 1, 16, 128>}, {pipeline_mode = #tpu.pipeline_mode<synchronous>, transform_indices = @transform_1, window_bounds = array<i64: 3, 128, 128>}, {pipeline_mode = #tpu.pipeline_mode<synchronous>, transform_indices = @transform_2, window_bounds = array<i64: 3, 128, 128>}, {pipeline_mode = #tpu.pipeline_mode<synchronous>, transform_indices = @transform_3, window_bounds = array<i64: 1, 128>}, {pipeline_mode = #tpu.pipeline_mode<synchronous>, transform_indices = @transform_4, window_bounds = array<i64: 1, 128>}, {transform_indices = @transform_5, window_bounds = array<i64: 1, 16, 128>}]} {
    %c0 = arith.constant 0 : index
    %c0_0 = arith.constant 0 : index
    %c0_1 = arith.constant 0 : index
    %0 = vector.load %arg1[%c0, %c0_0, %c0_1] : memref<1x16x128xf32, #tpu.memory_space<vmem>>, vector<1x16x128xf32>
    %1 = arith.truncf %0 : vector<1x16x128xf32> to vector<1x16x128xbf16>
    %2 = vector.shape_cast %1 : vector<1x16x128xbf16> to vector<16x128xbf16>
    %c1 = arith.constant 1 : index
    %c0_2 = arith.constant 0 : index
    %c0_3 = arith.constant 0 : index
    %3 = vector.load %arg2[%c1, %c0_2, %c0_3] : memref<3x128x128xbf16, #tpu.memory_space<vmem>>, vector<1x128x128xbf16>
    %4 = vector.shape_cast %3 : vector<1x128x128xbf16> to vector<128x128xbf16>
    %cst = arith.constant dense<0.000000e+00> : vector<16x128xf32>
    %5 = tpu.matmul %2, %4, %cst {dimension_numbers = #tpu.dot_dimension_numbers<[1], [0], [0], [1], [0, 0, 1, 1], [], []>} : vector<16x128xbf16>, vector<128x128xbf16>, vector<16x128xf32> -> vector<16x128xf32>
    %6 = vector.shape_cast %5 : vector<16x128xf32> to vector<1x16x128xf32>
    %c0_4 = arith.constant 0 : index
    %c0_5 = arith.constant 0 : index
    %c0_6 = arith.constant 0 : index
    %7 = vector.load %arg7[%c0_4, %c0_5, %c0_6] : memref<1x16x128xf32, #tpu.memory_space<vmem>>, vector<1x16x128xf32>
    tpu.vector_store %arg7[%c0_4, %c0_5, %c0_6], %6 {strides = array<i32>} : memref<1x16x128xf32, #tpu.memory_space<vmem>>, vector<1x16x128xf32>,
    %c0_7 = arith.constant 0 : index
    %c0_8 = arith.constant 0 : index
    %c0_9 = arith.constant 0 : index
    %8 = vector.load %arg2[%c0_7, %c0_8, %c0_9] : memref<3x128x128xbf16, #tpu.memory_space<vmem>>, vector<1x128x128xbf16>
    %9 = vector.shape_cast %8 : vector<1x128x128xbf16> to vector<128x128xbf16>
    %cst_10 = arith.constant dense<0.000000e+00> : vector<16x128xf32>
    %10 = tpu.matmul %2, %9, %cst_10 {dimension_numbers = #tpu.dot_dimension_numbers<[1], [0], [0], [1], [0, 0, 1, 1], [], []>} : vector<16x128xbf16>, vector<128x128xbf16>, vector<16x128xf32> -> vector<16x128xf32>
    %c0_11 = arith.constant 0 : index
    %c1_12 = arith.constant 1 : index
    %c0_13 = arith.constant 0 : index
    %11 = vector.load %arg7[%c0_11, %c1_12, %c0_13] : memref<1x16x128xf32, #tpu.memory_space<vmem>>, vector<1x15x128xf32>
    %12 = vector.shape_cast %10 : vector<16x128xf32> to vector<1x16x128xf32>
    %13 = vector.extract_strided_slice %12 {offsets = [0, 0, 0], sizes = [1, 15, 128], strides = [1, 1, 1]} : vector<1x16x128xf32> to vector<1x15x128xf32>
    %14 = arith.addf %11, %13 : vector<1x15x128xf32>
    %c0_14 = arith.constant 0 : index
    %c1_15 = arith.constant 1 : index
    %c0_16 = arith.constant 0 : index
    %15 = vector.load %arg7[%c0_14, %c1_15, %c0_16] : memref<1x16x128xf32, #tpu.memory_space<vmem>>, vector<1x15x128xf32>
    tpu.vector_store %arg7[%c0_14, %c1_15, %c0_16], %14 {strides = array<i32>} : memref<1x16x128xf32, #tpu.memory_space<vmem>>, vector<1x15x128xf32>,
    %c2 = arith.constant 2 : index
    %c0_17 = arith.constant 0 : index
    %c0_18 = arith.constant 0 : index
    %16 = vector.load %arg2[%c2, %c0_17, %c0_18] : memref<3x128x128xbf16, #tpu.memory_space<vmem>>, vector<1x128x128xbf16>
    %17 = vector.shape_cast %16 : vector<1x128x128xbf16> to vector<128x128xbf16>
    %cst_19 = arith.constant dense<0.000000e+00> : vector<16x128xf32>
    %18 = tpu.matmul %2, %17, %cst_19 {dimension_numbers = #tpu.dot_dimension_numbers<[1], [0], [0], [1], [0, 0, 1, 1], [], []>} : vector<16x128xbf16>, vector<128x128xbf16>, vector<16x128xf32> -> vector<16x128xf32>
    %c0_20 = arith.constant 0 : index
    %c0_21 = arith.constant 0 : index
    %c0_22 = arith.constant 0 : index
    %19 = vector.load %arg7[%c0_20, %c0_21, %c0_22] : memref<1x16x128xf32, #tpu.memory_space<vmem>>, vector<1x15x128xf32>
    %20 = vector.shape_cast %18 : vector<16x128xf32> to vector<1x16x128xf32>
    %21 = vector.extract_strided_slice %20 {offsets = [0, 1, 0], sizes = [1, 15, 128], strides = [1, 1, 1]} : vector<1x16x128xf32> to vector<1x15x128xf32>
    %22 = arith.addf %19, %21 : vector<1x15x128xf32>
    %c0_23 = arith.constant 0 : index
    %c0_24 = arith.constant 0 : index
    %c0_25 = arith.constant 0 : index
    %23 = vector.load %arg7[%c0_23, %c0_24, %c0_25] : memref<1x16x128xf32, #tpu.memory_space<vmem>>, vector<1x15x128xf32>
    tpu.vector_store %arg7[%c0_23, %c0_24, %c0_25], %22 {strides = array<i32>} : memref<1x16x128xf32, #tpu.memory_space<vmem>>, vector<1x15x128xf32>,
    %c0_26 = arith.constant 0 : index
    %c0_27 = arith.constant 0 : index
    %c0_28 = arith.constant 0 : index
    %24 = vector.load %arg7[%c0_26, %c0_27, %c0_28] : memref<1x16x128xf32, #tpu.memory_space<vmem>>, vector<1x16x128xf32>
    %c0_29 = arith.constant 0 : index
    %c0_30 = arith.constant 0 : index
    %25 = vector.load %arg4[%c0_29, %c0_30] : memref<1x128xf32, #tpu.memory_space<vmem>>, vector<1x128xf32>
    %26 = vector.shape_cast %25 : vector<1x128xf32> to vector<1x1x128xf32>
    %27 = vector.broadcast %26 : vector<1x1x128xf32> to vector<1x16x128xf32>
    %28 = arith.addf %24, %27 : vector<1x16x128xf32>
    %cst_31 = arith.constant 0.000000e+00 : f32
    %29 = vector.broadcast %cst_31 : f32 to vector<1x16x128xf32>
    %30 = arith.maximumf %28, %29 : vector<1x16x128xf32>
    %31 = arith.truncf %30 : vector<1x16x128xf32> to vector<1x16x128xbf16>
    %32 = vector.shape_cast %31 : vector<1x16x128xbf16> to vector<16x128xbf16>
    %c1_32 = arith.constant 1 : index
    %c0_33 = arith.constant 0 : index
    %c0_34 = arith.constant 0 : index
    %33 = vector.load %arg3[%c1_32, %c0_33, %c0_34] : memref<3x128x128xbf16, #tpu.memory_space<vmem>>, vector<1x128x128xbf16>
    %34 = vector.shape_cast %33 : vector<1x128x128xbf16> to vector<128x128xbf16>
    %cst_35 = arith.constant dense<0.000000e+00> : vector<16x128xf32>
    %35 = tpu.matmul %32, %34, %cst_35 {dimension_numbers = #tpu.dot_dimension_numbers<[1], [0], [0], [1], [0, 0, 1, 1], [], []>} : vector<16x128xbf16>, vector<128x128xbf16>, vector<16x128xf32> -> vector<16x128xf32>
    %36 = vector.shape_cast %35 : vector<16x128xf32> to vector<1x16x128xf32>
    %c0_36 = arith.constant 0 : index
    %c0_37 = arith.constant 0 : index
    %c0_38 = arith.constant 0 : index
    %37 = vector.load %arg7[%c0_36, %c0_37, %c0_38] : memref<1x16x128xf32, #tpu.memory_space<vmem>>, vector<1x16x128xf32>
    tpu.vector_store %arg7[%c0_36, %c0_37, %c0_38], %36 {strides = array<i32>} : memref<1x16x128xf32, #tpu.memory_space<vmem>>, vector<1x16x128xf32>,
    %c0_39 = arith.constant 0 : index
    %c0_40 = arith.constant 0 : index
    %c0_41 = arith.constant 0 : index
    %38 = vector.load %arg3[%c0_39, %c0_40, %c0_41] : memref<3x128x128xbf16, #tpu.memory_space<vmem>>, vector<1x128x128xbf16>
    %39 = vector.shape_cast %38 : vector<1x128x128xbf16> to vector<128x128xbf16>
    %cst_42 = arith.constant dense<0.000000e+00> : vector<16x128xf32>
    %40 = tpu.matmul %32, %39, %cst_42 {dimension_numbers = #tpu.dot_dimension_numbers<[1], [0], [0], [1], [0, 0, 1, 1], [], []>} : vector<16x128xbf16>, vector<128x128xbf16>, vector<16x128xf32> -> vector<16x128xf32>
    %c0_43 = arith.constant 0 : index
    %c1_44 = arith.constant 1 : index
    %c0_45 = arith.constant 0 : index
    %41 = vector.load %arg7[%c0_43, %c1_44, %c0_45] : memref<1x16x128xf32, #tpu.memory_space<vmem>>, vector<1x15x128xf32>
    %42 = vector.shape_cast %40 : vector<16x128xf32> to vector<1x16x128xf32>
    %43 = vector.extract_strided_slice %42 {offsets = [0, 0, 0], sizes = [1, 15, 128], strides = [1, 1, 1]} : vector<1x16x128xf32> to vector<1x15x128xf32>
    %44 = arith.addf %41, %43 : vector<1x15x128xf32>
    %c0_46 = arith.constant 0 : index
    %c1_47 = arith.constant 1 : index
    %c0_48 = arith.constant 0 : index
    %45 = vector.load %arg7[%c0_46, %c1_47, %c0_48] : memref<1x16x128xf32, #tpu.memory_space<vmem>>, vector<1x15x128xf32>
    tpu.vector_store %arg7[%c0_46, %c1_47, %c0_48], %44 {strides = array<i32>} : memref<1x16x128xf32, #tpu.memory_space<vmem>>, vector<1x15x128xf32>,
    %c2_49 = arith.constant 2 : index
    %c0_50 = arith.constant 0 : index
    %c0_51 = arith.constant 0 : index
    %46 = vector.load %arg3[%c2_49, %c0_50, %c0_51] : memref<3x128x128xbf16, #tpu.memory_space<vmem>>, vector<1x128x128xbf16>
    %47 = vector.shape_cast %46 : vector<1x128x128xbf16> to vector<128x128xbf16>
    %cst_52 = arith.constant dense<0.000000e+00> : vector<16x128xf32>
    %48 = tpu.matmul %32, %47, %cst_52 {dimension_numbers = #tpu.dot_dimension_numbers<[1], [0], [0], [1], [0, 0, 1, 1], [], []>} : vector<16x128xbf16>, vector<128x128xbf16>, vector<16x128xf32> -> vector<16x128xf32>
    %c0_53 = arith.constant 0 : index
    %c0_54 = arith.constant 0 : index
    %c0_55 = arith.constant 0 : index
    %49 = vector.load %arg7[%c0_53, %c0_54, %c0_55] : memref<1x16x128xf32, #tpu.memory_space<vmem>>, vector<1x15x128xf32>
    %50 = vector.shape_cast %48 : vector<16x128xf32> to vector<1x16x128xf32>
    %51 = vector.extract_strided_slice %50 {offsets = [0, 1, 0], sizes = [1, 15, 128], strides = [1, 1, 1]} : vector<1x16x128xf32> to vector<1x15x128xf32>
    %52 = arith.addf %49, %51 : vector<1x15x128xf32>
    %c0_56 = arith.constant 0 : index
    %c0_57 = arith.constant 0 : index
    %c0_58 = arith.constant 0 : index
    %53 = vector.load %arg7[%c0_56, %c0_57, %c0_58] : memref<1x16x128xf32, #tpu.memory_space<vmem>>, vector<1x15x128xf32>
    tpu.vector_store %arg7[%c0_56, %c0_57, %c0_58], %52 {strides = array<i32>} : memref<1x16x128xf32, #tpu.memory_space<vmem>>, vector<1x15x128xf32>,
    %c0_59 = arith.constant 0 : index
    %c0_60 = arith.constant 0 : index
    %c0_61 = arith.constant 0 : index
    %54 = vector.load %arg7[%c0_59, %c0_60, %c0_61] : memref<1x16x128xf32, #tpu.memory_space<vmem>>, vector<1x16x128xf32>
    %c0_62 = arith.constant 0 : index
    %c0_63 = arith.constant 0 : index
    %55 = vector.load %arg5[%c0_62, %c0_63] : memref<1x128xf32, #tpu.memory_space<vmem>>, vector<1x128xf32>
    %56 = vector.shape_cast %55 : vector<1x128xf32> to vector<1x1x128xf32>
    %57 = vector.broadcast %56 : vector<1x1x128xf32> to vector<1x16x128xf32>
    %58 = arith.addf %54, %57 : vector<1x16x128xf32>
    %59 = arith.addf %58, %0 : vector<1x16x128xf32>
    %cst_64 = arith.constant 0.000000e+00 : f32
    %60 = vector.broadcast %cst_64 : f32 to vector<1x16x128xf32>
    %61 = arith.maximumf %59, %60 : vector<1x16x128xf32>
    %c0_65 = arith.constant 0 : index
    %c0_66 = arith.constant 0 : index
    %c0_67 = arith.constant 0 : index
    %62 = vector.load %arg6[%c0_65, %c0_66, %c0_67] : memref<1x16x128xf32, #tpu.memory_space<vmem>>, vector<1x16x128xf32>
    tpu.vector_store %arg6[%c0_65, %c0_66, %c0_67], %61 {strides = array<i32>} : memref<1x16x128xf32, #tpu.memory_space<vmem>>, vector<1x16x128xf32>,
    return
  }
  func.func @transform_0(%arg0: i32) -> (i32, i32, i32) {
    %c0_i32 = arith.constant 0 : i32
    %c0_i32_0 = arith.constant 0 : i32
    %c0_i32_1 = arith.constant 0 : i32
    return %arg0, %c0_i32, %c0_i32_0 : i32, i32, i32
  }
  func.func @transform_1(%arg0: i32) -> (i32, i32, i32) {
    %c0_i32 = arith.constant 0 : i32
    %c0_i32_0 = arith.constant 0 : i32
    %c0_i32_1 = arith.constant 0 : i32
    %c0_i32_2 = arith.constant 0 : i32
    return %c0_i32, %c0_i32_0, %c0_i32_1 : i32, i32, i32
  }
  func.func @transform_2(%arg0: i32) -> (i32, i32, i32) {
    %c0_i32 = arith.constant 0 : i32
    %c0_i32_0 = arith.constant 0 : i32
    %c0_i32_1 = arith.constant 0 : i32
    %c0_i32_2 = arith.constant 0 : i32
    return %c0_i32, %c0_i32_0, %c0_i32_1 : i32, i32, i32
  }
  func.func @transform_3(%arg0: i32) -> (i32, i32) {
    %c0_i32 = arith.constant 0 : i32
    %c0_i32_0 = arith.constant 0 : i32
    %c0_i32_1 = arith.constant 0 : i32
    return %c0_i32, %c0_i32_0 : i32, i32
  }
  func.func @transform_4(%arg0: i32) -> (i32, i32) {
    %c0_i32 = arith.constant 0 : i32
    %c0_i32_0 = arith.constant 0 : i32
    %c0_i32_1 = arith.constant 0 : i32
    return %c0_i32, %c0_i32_0 : i32, i32
  }
  func.func @transform_5(%arg0: i32) -> (i32, i32, i32) {
    %c0_i32 = arith.constant 0 : i32
    %c0_i32_0 = arith.constant 0 : i32
    %c0_i32_1 = arith.constant 0 : i32
    return %arg0, %c0_i32, %c0_i32_0 : i32, i32, i32
  }
}

</mosaic_0001>

<bundles_post_ra>
// kernel: tpu_custom_call.1
= control target key start
LH: loop header
LB: loop body
LE: loop exit
PB: predicated region body
PF: predicated region fallthrough
CT: control target
= control target key end

     0   :  { %10 = vsyncpa [#allocation4], 0  ;;  %s1975_s0 = inlined_call_operand.hbm [shape: f32[2,16,128], index: 0, kind: input, shape index: {}]   ;;  %s1976_s1 = inlined_call_operand.hbm [shape: bf16[3,128,128], index: 1, kind: input, shape index: {}]   ;;  %s1977_s2 = inlined_call_operand.hbm [shape: bf16[3,128,128], index: 2, kind: input, shape index: {}]   ;;  %s1978_s3 = inlined_call_operand.vmem [shape: f32[1,128], index: 3, kind: input, shape index: {}]   ;;  %s1979_s4 = inlined_call_operand.vmem [shape: f32[1,128], index: 4, kind: input, shape index: {}]   ;;  %s1980_s5 = inlined_call_operand.hbm [shape: f32[2,16,128], index: 5, kind: output, shape index: {}]  }
   0x1   :  { %12 = vsyncpa [#allocation4 + $0x1], 0 }
   0x2   :  { %13 = vsyncpa [#allocation7], 0 }
   0x3   :  { %14 = vsyncpa [#allocation5], 0 }
   0x4   :  { %16 = vsyncpa [#allocation5 + $0x1], 0  ;;  %s1657_s18 = smov 0   ;;  %s1659_s19 = smov 0  }
   0x5   :  { %s1661_s20 = smov 0   ;;  %s1663_s21 = smov 0  }
   0x6 LB: > { %s1678_s22 = sadd.s32 4294967295, %s1613_s21   ;;  %s1090_s23 = sadd.s32 4294967294, %s1613_s21   ;;  %s1613_s21 = sphi %s1663_s21, %s2000_s21   ;;  %s1609_s20 = sphi %s1661_s20, %s1999_s20   ;;  %s1605_s19 = sphi %s1659_s19, %s1998_s19   ;;  %s1601_s18 = sphi %s1657_s18, %s1997_s18  }
   0x7   : > { %p42_p0 = scmp.ne.s32.totalorder %s1605_s19, %s1601_s18  ;;  %p1981_p1 = scmp.eq.s32.totalorder %s1678_s22, 0 }
   0x8   : > { %p156_p3 = scmp.eq.s32.totalorder %s1090_s23, 1  ;;  %p1091_p5 = scmp.ge.s32.totalorder %s1613_s21, 1 }
   0x9   : > { %p1687_p4 = por %p1981_p1, %p42_p0  ;;  %p163_p7 = scmp.lt.s32.totalorder %s1613_s21, 3 }
   0xa   : > { %p1692_p6 = por %p156_p3, %p42_p0  ;;  %s1615_s27 = smov [#allocation6]  }
   0xb   : > { %s1984_s24 = scalar_select %p1687_p4, 1, 0 }
   0xc   : > { %s1985_s25 = scalar_select %p1692_p6, 1, 0 }
   0xd   : > { %p1697_p8 = pnand %p1091_p5, %p163_p7  ;;  %s175_s28 = sshll.u32 %s1615_s27, 4  ;;  %s1701_s28 = int_to_ptr.vmem [resolvable:$true] %s175_s28 }
   0xe   : > { %s1616_s30 = smov [#allocation8]   ;;  %s1457_s9 = scalar_lea.hbm %s1976_s1, 3072 }
   0xf   : > { %p1346_p9 = pneg %p1697_p8  ;;  %s188_s6 = sshll.u32 %s1616_s30, 4  ;;  %s1712_s6 = int_to_ptr.vmem [resolvable:$true] %s188_s6 }
  0x10   : > { %p1458_p12 = scmp.ne.s32.totalorder %s1976_s1, %s1457_s9  ;;  %p1464_p5 = scmp.lt.u32.totalorder %s1457_s9, %s1976_s1 }
  0x11   : > { %p1708_p11 = pnand %p1346_p9, %p1981_p1 }
  0x13   : > { %p1459_p13 = pneg %p1708_p11 }
  0x15   : > { %p1460_p0 = pnand %p1459_p13, %p1458_p12 }
  0x17   : > { %p1461_p3 = pneg %p1460_p0 }
  0x19   : > { %p1466_p7 = pnand %p1464_p5, %p1461_p3 }
  0x1b   : > { %1469 = shalt.err (!%p1466_p7)
}
  0x1c   : > { %s1470_s14 = scalar_lea.vmem %s1701_s28, 3072  ;;  %p1478_p2 = scmp.lt.s32.totalorder %s1701_s28, %s1701_s28 }
  0x1d   : > { %p1471_p9 = scmp.ne.s32.totalorder %s1701_s28, %s1470_s14  ;;  %p1479_p12 = scmp.lt.s32.totalorder %s1470_s14, %s1470_s14 }
  0x1f   : > { %p1473_p10 = pnand %p1471_p9, %p1459_p13  ;;  %p1480_p0 = por %p1479_p12, %p1478_p2 }
  0x21   : > { %p1474_p1 = pneg %p1473_p10 }
  0x23   : > { %p1481_p6 = pnand %p1480_p0, %p1474_p1 }
  0x25   : > { %1484 = shalt.err (!%p1481_p6)
}
  0x26   : > { %s1617_s15 = smov 64   ;;  %s1618_s16 = smov 4  }
  0x27   : > { %1349 = dma.hbm_to_vmem [thread:$0]  (!%p1708_p11), %s1976_s1, 3072, %s1701_s28, [#allocation7], %s1617_s15, %s1617_s15, %s1618_s16  }
  0x28   : > { %s1485_s7 = scalar_lea.hbm %s1977_s2, 3072 }
  0x29   : > { %p1486_p2 = scmp.ne.s32.totalorder %s1977_s2, %s1485_s7  ;;  %p1492_p10 = scmp.lt.u32.totalorder %s1485_s7, %s1977_s2 }
  0x2b   : > { %p1488_p1 = pnand %p1486_p2, %p1459_p13 }
  0x2d   : > { %p1489_p6 = pneg %p1488_p1 }
  0x2f   : > { %p1494_p3 = pnand %p1492_p10, %p1489_p6 }
  0x31   : > { %1497 = shalt.err (!%p1494_p3)
}
  0x32   : > { %s1498_s28 = scalar_lea.vmem %s1712_s6, 3072  ;;  %p1506_p12 = scmp.lt.s32.totalorder %s1712_s6, %s1712_s6 }
  0x33   : > { %p1499_p5 = scmp.ne.s32.totalorder %s1712_s6, %s1498_s28  ;;  %p1507_p0 = scmp.lt.s32.totalorder %s1498_s28, %s1498_s28 }
  0x35   : > { %p1501_p7 = pnand %p1499_p5, %p1459_p13  ;;  %p1508_p2 = por %p1507_p0, %p1506_p12 }
  0x37   : > { %p1502_p9 = pneg %p1501_p7 }
  0x39   : > { %p1509_p1 = pnand %p1508_p2, %p1502_p9 }
  0x3b   : > { %1512 = shalt.err (!%p1509_p1)
}
  0x3c   : > { %1352 = dma.hbm_to_vmem [thread:$0]  (!%p1708_p11), %s1977_s2, 3072, %s1712_s6, [#allocation7], %s1617_s15, %s1617_s15, %s1618_s16  }
  0x3d   : > { %s1767_s14 = sadd.s32 1, %s1613_s21   ;;  %s29_s29 = sadd.s32 1, %s1609_s20 }
  0x3e   : > { %s26_s17 = ssub.s32 %s1613_s21, %s1767_s14  ;;  %p36_p13 = scmp.ne.s32.totalorder %s1609_s20, %s1605_s19 }
  0x3f   : > { %p27_p6 = scmp.eq.s32.totalorder %s26_s17, 0  ;;  %p37_p10 = scmp.eq.s32.totalorder %s1613_s21, 0 }
  0x40   : > { %p1988_p3 = scmp.eq.s32.totalorder %s1678_s22, 1  ;;  %p1363_p7 = scmp.lt.s32.totalorder %s1613_s21, 2 }
  0x41   : > { %s1783_s27 = scalar_select %p27_p6, %s1609_s20, %s29_s29  }
  0x42   : > { %p1777_p5 = por %p1988_p3, %p36_p13  ;;  %p38_p9 = por %p37_p10, %p36_p13 }
  0x43   : > { %s208_s30 = sand.u32 1, %s1609_s20   ;;  %s1158_s6 = sshll.u32 %s1613_s21, 8 }
  0x44   : > { %s1989_s23 = scalar_select %p1777_p5, 1, 0 }
  0x45   : > { %s1095_s7 = sshll.u32 %s208_s30, 4  ;;  %s1790_s8 = scalar_lea.hbm %s1975_s0, %s1158_s6 }
  0x46   : > { %s212_s9 = scalar_lea.vmem [#allocation3], %s1095_s7  ;;  %p1794_p11 = pnand %p1363_p7, %p38_p9 }
  0x47   : > { %s219_s10 = sshll.u32 %s212_s9, 4  ;;  %s1798_s28 = scalar_lea.sflag [#allocation4], %s208_s30  ;;  %s1792_s10 = int_to_ptr.vmem [resolvable:$true] %s219_s10 }
  0x48   : > { %s1513_s12 = scalar_lea.hbm %s1790_s8, 256  ;;  %p1515_p0 = pneg %p1794_p11 }
  0x49   : > { %p1514_p12 = scmp.ne.s32.totalorder %s1790_s8, %s1513_s12  ;;  %s1518_s17 = scalar_lea.hbm %s1975_s0, 512 }
  0x4a   : > { %p1519_p13 = scmp.lt.u32.totalorder %s1790_s8, %s1975_s0  ;;  %p1520_p6 = scmp.lt.u32.totalorder %s1518_s17, %s1513_s12 }
  0x4b   : > { %p1516_p2 = pnand %p1515_p0, %p1514_p12  ;;  %p1522_p3 = scmp.lt.u32.totalorder %s1513_s12, %s1790_s8 }
  0x4c   : > { %p1521_p10 = por %p1520_p6, %p1519_p13 }
  0x4d   : > { %p1517_p1 = pneg %p1516_p2 }
  0x4e   : > { %p1523_p7 = por %p1522_p3, %p1521_p10 }
  0x50   : > { %p1524_p9 = pnand %p1523_p7, %p1517_p1 }
  0x52   : > { %1527 = shalt.err (!%p1524_p9)
}
  0x53   : > { %s1528_s30 = scalar_lea.vmem %s1792_s10, 256  ;;  %s1619_s15 = smov [#allocation3]  }
  0x54   : > { %p1529_p12 = scmp.ne.s32.totalorder %s1792_s10, %s1528_s30  ;;  %s1533_s16 = sshll.u32 %s1619_s15, 4  ;;  %s1534_s16 = int_to_ptr.vmem [resolvable:$false] %s1533_s16 }
  0x55   : > { %s1535_s9 = scalar_lea.vmem %s1534_s16, 512  ;;  %p1536_p4 = scmp.lt.s32.totalorder %s1792_s10, %s1534_s16 }
  0x56   : > { %p1531_p2 = pnand %p1529_p12, %p1515_p0  ;;  %p1537_p13 = scmp.lt.s32.totalorder %s1535_s9, %s1528_s30 }
  0x58   : > { %p1532_p5 = pneg %p1531_p2  ;;  %p1538_p6 = por %p1537_p13, %p1536_p4 }
  0x5a   : > { %p1539_p10 = pnand %p1538_p6, %p1532_p5 }
  0x5c   : > { %1542 = shalt.err (!%p1539_p10)
}
  0x5d   : > { %s1620_s12 = smov 128   ;;  %s1621_s13 = smov 8  }
  0x5e   : > { %1356 = dma.hbm_to_vmem [thread:$0]  (!%p1794_p11), %s1790_s8, 256, %s1792_s10, %s1798_s28, %s1620_s12, %s1620_s12, %s1621_s13  }
  0x5f   : > { %231 = sbr.rel (%p1697_p8) target bundleno = 683 (0x2ab), region = 40  ;;  %s1829_s29 = sand.u32 (!%p1697_p8), 1, %s1605_s19  }
  0x60   : > { %s1099_s17 = sshll.u32 (!%p1697_p8), %s1829_s29, 4  ;;  %s234_s7 = scalar_lea.sflag (!%p1697_p8), [#allocation4], %s1829_s29 }
  0x61   : > { %s1835_s6 = scalar_lea.vmem (!%p1697_p8), [#allocation3], %s1099_s17  ;;  %p1991_p4 = scmp.ne.s32.totalorder (!%p1697_p8), %s1984_s24, 0 }
  0x66   : > { %1588 = dma.done.wait (%p1991_p4), %s234_s7, 256  }
  0x67   : > { %1590 = vsyncadd (%p1991_p4), %s234_s7, 4294967040  ;;  %p1992_p5 = scmp.eq.s32.totalorder %s1678_s22, 0 }
  0x69   : > { %1592 = dma.done.wait (%p1992_p5), [#allocation7], 6144   ;;  %p1993_p8 = pmov %p1992_p5 }
  0x6a   : > { %v1622_v0 = vmov 0.0   ;;  %vm1623_vm0 = vmmov 0   ;;  %v1409_v1 = vld [vmem:[#allocation6 + $0x40] sm:$0xff]   ;;  %v1410_v2 = vld [vmem:[#allocation6 + $0x48] sm:$0xff]   ;;  %v1411_v5 = vld [vmem:[#allocation6 + $0x50] sm:$0xff]   ;;  %vm605_vm1 = vcmask 1046528  }
  0x6b   : > { %1594 = vsyncadd (%p1993_p8), [#allocation7], 4294961152  ;;  %1214 = vmatprep.subr.bf16.mxu0 %v1622_v0  ;;  %1234 = vmatprep.subr.bf16.mxu1 %v1622_v0  ;;  %v1412_v3 = vld [vmem:[#allocation6] sm:$0xff]   ;;  %v1414_v4 = vld [vmem:[#allocation6 + $0x8] sm:$0xff]   ;;  %s271_s11 = scalar_lea.vmem [#allocation9], %s1099_s17  ;;  %s1159_s28 = sshll.u32 %s1678_s22, 8 }
  0x6c   : > { %1230 = vmatprep.mubr.msk.bf16.mxu0 %vm1623_vm0, %v1622_v0  ;;  %1250 = vmatprep.mubr.msk.bf16.mxu1 %vm1623_vm0, %v1622_v0  ;;  %v1416_v6 = vld [vmem:[#allocation6 + $0x10] sm:$0xff]   ;;  %v1413_v7 = vld [vmem:[#allocation6 + $0x58] sm:$0xff]   ;;  %v1415_v9 = vld [vmem:[#allocation6 + $0x60] sm:$0xff]   ;;  %s998_s30 = sshll.u32 %s271_s11, 4  ;;  %s1929_s9 = scalar_lea.hbm %s1980_s5, %s1159_s28  ;;  %s1931_s30 = int_to_ptr.vmem [resolvable:$true] %s998_s30 }
  0x6d   : > { %1215 = vmatpush3.bf16.msra.mxu0 %v1409_v1  ;;  %1235 = vmatpush3.bf16.msra.mxu1 %v1412_v3  ;;  %v1418_v8 = vld [vmem:[#allocation6 + $0x18] sm:$0xff]   ;;  %v1420_v10 = vld [vmem:[#allocation6 + $0x20] sm:$0xff]   ;;  %v1417_v11 = vld [vmem:[#allocation6 + $0x68] sm:$0xff]   ;;  %s985_s12 = scalar_lea.sflag [#allocation5], %s1829_s29  ;;  %s1543_s13 = scalar_lea.vmem %s1931_s30, 256 }
  0x6e   : > { %1216 = vmatprep.subr.bf16.mxu0 %v1622_v0  ;;  %1236 = vmatprep.subr.bf16.mxu1 %v1622_v0  ;;  %v1422_v12 = vld [vmem:[#allocation6 + $0x28] sm:$0xff]   ;;  %v1419_v13 = vld [vmem:[#allocation6 + $0x70] sm:$0xff]   ;;  %v1421_v14 = vld [vmem:[#allocation6 + $0x78] sm:$0xff]   ;;  %p1544_p11 = scmp.ne.s32.totalorder %s1931_s30, %s1543_s13  ;;  %p1994_p0 = scmp.ne.s32.totalorder %s1989_s23, 0 }
  0x6f   : > { %v1863_v15 = vld [vmem:[%s1835_s6] sm:$0xff]  ;;  %v1866_v16 = vld [vmem:[%s1835_s6 + $0x8] sm:$0xff]  ;;  %s1624_s22 = smov [#allocation9]  }
  0x70   : > { %v1423_v17 = vld [vmem:[#allocation6 + $0x30] sm:$0xff]   ;;  %v1425_v18 = vld [vmem:[#allocation6 + $0x38] sm:$0xff]   ;;  %v1424_v19 = vld [vmem:[#allocation6 + $0x80] sm:$0xff]   ;;  %v275_v20 = vpack.c.bf16 %v1866_v16, %v1863_v15  ;;  %p1545_p1 = pnand %p1544_p11, %p1994_p0  ;;  %s1547_s17 = sshll.u32 %s1624_s22, 4  ;;  %s1548_s17 = int_to_ptr.vmem [resolvable:$false] %s1547_s17 }
  0x71   : > { %1217 = vmatpush3.bf16.msra.mxu0 %v1410_v2  ;;  %1237 = vmatpush3.bf16.msra.mxu1 %v1414_v4  ;;  %v1426_v21 = vld [vmem:[#allocation6 + $0x88] sm:$0xff]   ;;  %v1427_v22 = vld [vmem:[#allocation6 + $0x90] sm:$0xff]   ;;  %v1428_v23 = vld [vmem:[#allocation6 + $0x98] sm:$0xff]   ;;  %s1549_s7 = scalar_lea.vmem %s1548_s17, 512  ;;  %p1550_p7 = scmp.lt.s32.totalorder %s1931_s30, %s1548_s17 }
  0x72   : > { %1218 = vmatprep.subr.bf16.mxu0 %v1622_v0  ;;  %1238 = vmatprep.subr.bf16.mxu1 %v1622_v0  ;;  %v1429_v24 = vld [vmem:[#allocation6 + $0xa0] sm:$0xff]   ;;  %v1430_v25 = vld [vmem:[#allocation6 + $0xa8] sm:$0xff]   ;;  %v1431_v26 = vld [vmem:[#allocation6 + $0xb0] sm:$0xff]   ;;  %p1546_p3 = pneg %p1545_p1  ;;  %p1551_p9 = scmp.lt.s32.totalorder %s1549_s7, %s1543_s13 }
  0x73   : > { %v1432_v27 = vld [vmem:[#allocation6 + $0xb8] sm:$0xff]   ;;  %v1433_v28 = vld [vmem:[#allocation8 + $0x40] sm:$0xff]   ;;  %v1435_v30 = vld [vmem:[#allocation8 + $0x48] sm:$0xff]  }
  0x74   : > { %v1434_v29 = vld [vmem:[#allocation8] sm:$0xff]   ;;  %v1436_v31 = vld [vmem:[#allocation8 + $0x8] sm:$0xff]   ;;  %v1437_v32 = vld [vmem:[#allocation8 + $0x50] sm:$0xff]   ;;  %p1552_p12 = por %p1551_p9, %p1550_p7 }
  0x75   : > { %1219 = vmatpush3.bf16.msra.mxu0 %v1411_v5  ;;  %1239 = vmatpush3.bf16.msra.mxu1 %v1416_v6  ;;  %v1438_v33 = vld [vmem:[#allocation8 + $0x10] sm:$0xff]   ;;  %v1439_v34 = vld [vmem:[#allocation8 + $0x58] sm:$0xff]   ;;  %v1441_v36 = vld [vmem:[#allocation8 + $0x60] sm:$0xff]  }
  0x76   : > { %1220 = vmatprep.subr.bf16.mxu0 %v1622_v0  ;;  %1240 = vmatprep.subr.bf16.mxu1 %v1622_v0  ;;  %v1440_v35 = vld [vmem:[#allocation8 + $0x18] sm:$0xff]   ;;  %v1442_v37 = vld [vmem:[#allocation8 + $0x20] sm:$0xff]   ;;  %v1443_v38 = vld [vmem:[#allocation8 + $0x68] sm:$0xff]   ;;  %p1553_p2 = pnand %p1552_p12, %p1546_p3 }
  0x77   : > { %v1444_v39 = vld [vmem:[#allocation8 + $0x28] sm:$0xff]   ;;  %v1445_v40 = vld [vmem:[#allocation8 + $0x70] sm:$0xff]   ;;  %v1447_v42 = vld [vmem:[#allocation8 + $0x78] sm:$0xff]  }
  0x78   : > { %v1446_v41 = vld [vmem:[#allocation8 + $0x30] sm:$0xff]   ;;  %v1448_v43 = vld [vmem:[#allocation8 + $0x38] sm:$0xff]  }
  0x79   : > { %1221 = vmatpush3.bf16.msra.mxu0 %v1413_v7  ;;  %1241 = vmatpush3.bf16.msra.mxu1 %v1418_v8  ;;  %v1127_v4 = vld [vmem:[%s1978_s3] ss:$0 sm:$0xff] }
  0x7a   : > { %1222 = vmatprep.subr.bf16.mxu0 %v1622_v0  ;;  %1242 = vmatprep.subr.bf16.mxu1 %v1622_v0 }
  0x7d   : > { %1223 = vmatpush3.bf16.msra.mxu0 %v1415_v9  ;;  %1243 = vmatpush3.bf16.msra.mxu1 %v1420_v10  ;;  %v1449_v10 = vld [vmem:[#allocation8 + $0x80] sm:$0xff]  }
  0x7e   : > { %1224 = vmatprep.subr.bf16.mxu0 %v1622_v0  ;;  %1244 = vmatprep.subr.bf16.mxu1 %v1622_v0 }
  0x81   : > { %1225 = vmatpush3.bf16.msra.mxu0 %v1417_v11  ;;  %1245 = vmatpush3.bf16.msra.mxu1 %v1422_v12  ;;  %v1450_v12 = vld [vmem:[#allocation8 + $0x88] sm:$0xff]  }
  0x82   : > { %1226 = vmatprep.subr.bf16.mxu0 %v1622_v0  ;;  %1246 = vmatprep.subr.bf16.mxu1 %v1622_v0 }
  0x85   : > { %1227 = vmatpush3.bf16.msra.mxu0 %v1419_v13  ;;  %1247 = vmatpush3.bf16.msra.mxu1 %v1423_v17  ;;  %v1451_v13 = vld [vmem:[#allocation8 + $0x90] sm:$0xff]   ;;  %v1453_v17 = vld [vmem:[#allocation8 + $0xa0] sm:$0xff]  }
  0x86   : > { %1228 = vmatprep.subr.bf16.mxu0 %v1622_v0  ;;  %1248 = vmatprep.subr.bf16.mxu1 %v1622_v0 }
  0x89   : > { %1229 = vmatpush3.bf16.msra.mxu0 %v1421_v14  ;;  %1249 = vmatpush3.bf16.msra.mxu1 %v1425_v18  ;;  %v1452_v14 = vld [vmem:[#allocation8 + $0x98] sm:$0xff]   ;;  %v1454_v18 = vld [vmem:[#allocation8 + $0xa8] sm:$0xff]  }
  0x8a   : > { %1254 = vmatprep.subr.bf16.mxu0 %v1622_v0  ;;  %1274 = vmatprep.subr.bf16.mxu1 %v1622_v0 }
  0x8c   : > { %1231 = vmatmul.mubr.bf16.vlgmr.msra.gmra.mrb[0].mxu0 %v275_v20  ;;  %1251 = vmatmul.mubr.bf16.vlgmr.msra.gmra.mrb[0].mxu1 %v275_v20 }
  0x8d   : > { %1255 = vmatpush3.bf16.msra.mxu0 %v1424_v19  ;;  %1270 = vmatprep.mubr.msk.bf16.mxu0 %vm1623_vm0, %v1622_v0  ;;  %v1455_v19 = vld [vmem:[#allocation8 + $0xb0] sm:$0xff]  }
  0x8e   : > { %1256 = vmatprep.subr.bf16.mxu0 %v1622_v0  ;;  %1290 = vmatprep.mubr.msk.bf16.mxu1 %vm1623_vm0, %v1622_v0 }
  0x8f   : > { %1275 = vmatpush3.bf16.msra.mxu1 %v1433_v28 }
  0x90   : > { %1276 = vmatprep.subr.bf16.mxu1 %v1622_v0 }
  0x91   : > { %1257 = vmatpush3.bf16.msra.mxu0 %v1426_v21 }
  0x92   : > { %1258 = vmatprep.subr.bf16.mxu0 %v1622_v0 }
  0x93   : > { %1277 = vmatpush3.bf16.msra.mxu1 %v1435_v30 }
  0x94   : > { %1278 = vmatprep.subr.bf16.mxu1 %v1622_v0 }
  0x95   : > { %1259 = vmatpush3.bf16.msra.mxu0 %v1427_v22 }
  0x96   : > { %1260 = vmatprep.subr.bf16.mxu0 %v1622_v0 }
  0x97   : > { %1279 = vmatpush3.bf16.msra.mxu1 %v1437_v32 }
  0x98   : > { %1280 = vmatprep.subr.bf16.mxu1 %v1622_v0 }
  0x99   : > { %1261 = vmatpush3.bf16.msra.mxu0 %v1428_v23 }
  0x9a   : > { %1262 = vmatprep.subr.bf16.mxu0 %v1622_v0 }
  0x9b   : > { %1281 = vmatpush3.bf16.msra.mxu1 %v1439_v34 }
  0x9c   : > { %1282 = vmatprep.subr.bf16.mxu1 %v1622_v0 }
  0x9d   : > { %1263 = vmatpush3.bf16.msra.mxu0 %v1429_v24 }
  0x9e   : > { %1264 = vmatprep.subr.bf16.mxu0 %v1622_v0 }
  0x9f   : > { %1283 = vmatpush3.bf16.msra.mxu1 %v1441_v36 }
  0xa0   : > { %1284 = vmatprep.subr.bf16.mxu1 %v1622_v0 }
  0xa1   : > { %1265 = vmatpush3.bf16.msra.mxu0 %v1430_v25 }
  0xa2   : > { %1266 = vmatprep.subr.bf16.mxu0 %v1622_v0 }
  0xa3   : > { %1285 = vmatpush3.bf16.msra.mxu1 %v1443_v38 }
  0xa4   : > { %1286 = vmatprep.subr.bf16.mxu1 %v1622_v0 }
  0xa5   : > { %1267 = vmatpush3.bf16.msra.mxu0 %v1431_v26 }
  0xa6   : > { %1268 = vmatprep.subr.bf16.mxu0 %v1622_v0 }
  0xa7   : > { %1287 = vmatpush3.bf16.msra.mxu1 %v1445_v40 }
  0xa8   : > { %1288 = vmatprep.subr.bf16.mxu1 %v1622_v0 }
  0xa9   : > { %1269 = vmatpush3.bf16.msra.mxu0 %v1432_v27 }
  0xaa   : > { %1294 = vmatprep.subr.bf16.mxu0 %v1622_v0 }
  0xab   : > { %1289 = vmatpush3.bf16.msra.mxu1 %v1447_v42  ;;  %v1152_v42 = vld [vmem:[%s1979_s4] ss:$0 sm:$0xff] }
  0xac   : > { %1271 = vmatmul.mubr.bf16.vlgmr.msra.gmra.mrb[4].mxu0 %v275_v20  ;;  %1314 = vmatprep.subr.bf16.mxu1 %v1622_v0  ;;  %v1456_v20 = vld [vmem:[#allocation8 + $0xb8] sm:$0xff]  }
  0xad   : > { %1310 = vmatprep.mubr.msk.bf16.mxu0 %vm1623_vm0, %v1622_v0  ;;  %1295 = vmatpush3.bf16.msra.mxu0 %v1434_v29 }
  0xae   : > { %1296 = vmatprep.subr.bf16.mxu0 %v1622_v0 }
  0xb1   : > { %1297 = vmatpush3.bf16.msra.mxu0 %v1436_v31 }
  0xb2   : > { %1298 = vmatprep.subr.bf16.mxu0 %v1622_v0 }
  0xb5   : > { %1299 = vmatpush3.bf16.msra.mxu0 %v1438_v33 }
  0xb6   : > { %1300 = vmatprep.subr.bf16.mxu0 %v1622_v0 }
  0xb9   : > { %1301 = vmatpush3.bf16.msra.mxu0 %v1440_v35 }
  0xba   : > { %1302 = vmatprep.subr.bf16.mxu0 %v1622_v0 }
  0xbd   : > { %1303 = vmatpush3.bf16.msra.mxu0 %v1442_v37 }
  0xbe   : > { %1304 = vmatprep.subr.bf16.mxu0 %v1622_v0 }
  0xc1   : > { %1305 = vmatpush3.bf16.msra.mxu0 %v1444_v39 }
  0xc2   : > { %1306 = vmatprep.subr.bf16.mxu0 %v1622_v0 }
  0xc5   : > { %1307 = vmatpush3.bf16.msra.mxu0 %v1446_v41 }
  0xc6   : > { %1308 = vmatprep.subr.bf16.mxu0 %v1622_v0 }
  0xc9   : > { %1309 = vmatpush3.bf16.msra.mxu0 %v1448_v43 }
 0x15f   : > { %v375_v44 = vpop.f32.mrb[0].mxu0  ;;  %v482_v48 = vpop.f32.mrb[0].mxu1 }
 0x160   : > { %382 = vst [vmem:[#allocation2] sm:$0xff] %v375_v44  ;;  %v1232_v45 = vpop.f32.mrb[1].mxu0  ;;  %v1252_v49 = vpop.f32.mrb[1].mxu1 }
 0x161   : > { %v378_v46 = vpop.f32.mrb[2].mxu0  ;;  %v485_v50 = vpop.f32.mrb[2].mxu1 }
 0x162   : > { %383 = vst [vmem:[#allocation2 + $0x8] sm:$0xff] %v378_v46  ;;  %v1233_v47 = vpop.f32.mrb[3].mxu0  ;;  %v1253_v51 = vpop.f32.mrb[3].mxu1 }
 0x169   : > { %v489_v52 = vld [vmem:[#allocation2 + $0x1] sm:$0xff]  ;;  %v490_v53 = vld [vmem:[#allocation2 + $0x9] sm:$0x7f] }
 0x16a   : > { %v491_v54 = vadd.f32 %v489_v52, %v482_v48  ;;  %v492_v55 = vadd.f32 %v490_v53, %v485_v50 }
 0x16c   : > { %493 = vst [vmem:[#allocation2 + $0x1] sm:$0xff] %v491_v54  ;;  %494 = vst [vmem:[#allocation2 + $0x9] sm:$0x7f] %v492_v55 }
 0x173   : > { %v602_v62 = vld [vmem:[#allocation2 + $0x8] sm:$0x7f]  ;;  %v601_v2 = vld [vmem:[#allocation2] sm:$0xff] }
 0x17f   : > { %v594_v56 = vpop.f32.mrb[4].mxu0 }
 0x180   : > { %v1272_v57 = vpop.f32.mrb[5].mxu0  ;;  %v606_v59 = vrot.slane %v594_v56, 1 }
 0x181   : > { %v597_v58 = vpop.f32.mrb[6].mxu0 }
 0x182   : > { %v607_v60 = vrot.slane %v597_v58, 1  ;;  %v1273_v61 = vpop.f32.mrb[7].mxu0 }
 0x184   : > { %v608_v63 = vsel %vm605_vm1, %v606_v59, %v607_v60  ;;  %v612_v1 = vadd.f32 %v607_v60, %v602_v62 }
 0x185   : > { %v611_v3 = vadd.f32 %v608_v63, %v601_v2 }
 0x186   : > { %614 = vst [vmem:[#allocation2 + $0x8] sm:$0x7f] %v612_v1 }
 0x187   : > { %v624_v5 = vadd.f32 %v1127_v4, %v611_v3 }
 0x189   : > { %v626_v8 = vmax.f32 %v624_v5, 0.0 }
 0x18d   : > { %v616_v6 = vld [vmem:[#allocation2 + $0x8] sm:$0xff] }
 0x18e   : > { %v625_v7 = vadd.f32 %v1127_v4, %v616_v6 }
 0x190   : > { %v627_v9 = vmax.f32 %v625_v7, 0.0 }
 0x192   : > { %v628_v11 = vpack.c.bf16 %v627_v9, %v626_v8 }
 0x194   : > { %1291 = vmatmul.mubr.bf16.vlgmr.msra.gmra.mrb[4].mxu1 %v628_v11  ;;  %1311 = vmatmul.mubr.bf16.vlgmr.msra.gmra.mrb[8].mxu0 %v628_v11 }
 0x195   : > { %1315 = vmatpush3.bf16.msra.mxu1 %v1449_v10  ;;  %1330 = vmatprep.mubr.msk.bf16.mxu1 %vm1623_vm0, %v1622_v0 }
 0x196   : > { %1316 = vmatprep.subr.bf16.mxu1 %v1622_v0 }
 0x199   : > { %1317 = vmatpush3.bf16.msra.mxu1 %v1450_v12 }
 0x19a   : > { %1318 = vmatprep.subr.bf16.mxu1 %v1622_v0 }
 0x19d   : > { %1319 = vmatpush3.bf16.msra.mxu1 %v1451_v13 }
 0x19e   : > { %1320 = vmatprep.subr.bf16.mxu1 %v1622_v0 }
 0x1a1   : > { %1321 = vmatpush3.bf16.msra.mxu1 %v1452_v14 }
 0x1a2   : > { %1322 = vmatprep.subr.bf16.mxu1 %v1622_v0 }
 0x1a5   : > { %1323 = vmatpush3.bf16.msra.mxu1 %v1453_v17 }
 0x1a6   : > { %1324 = vmatprep.subr.bf16.mxu1 %v1622_v0 }
 0x1a9   : > { %1325 = vmatpush3.bf16.msra.mxu1 %v1454_v18 }
 0x1aa   : > { %1326 = vmatprep.subr.bf16.mxu1 %v1622_v0 }
 0x1ad   : > { %1327 = vmatpush3.bf16.msra.mxu1 %v1455_v19 }
 0x1ae   : > { %1328 = vmatprep.subr.bf16.mxu1 %v1622_v0 }
 0x1b1   : > { %1329 = vmatpush3.bf16.msra.mxu1 %v1456_v20 }
 0x1b4   : > { %1331 = vmatmul.mubr.bf16.vlgmr.msra.gmra.mrb[8].mxu1 %v628_v11 }
 0x267   : > { %v728_v21 = vpop.f32.mrb[4].mxu1  ;;  %v835_v22 = vpop.f32.mrb[8].mxu0 }
 0x268   : > { %735 = vst [vmem:[#allocation2] sm:$0xff] %v728_v21  ;;  %v1292_v23 = vpop.f32.mrb[5].mxu1  ;;  %v1312_v24 = vpop.f32.mrb[9].mxu0 }
 0x269   : > { %v731_v25 = vpop.f32.mrb[6].mxu1  ;;  %v838_v26 = vpop.f32.mrb[10].mxu0 }
 0x26a   : > { %736 = vst [vmem:[#allocation2 + $0x8] sm:$0xff] %v731_v25  ;;  %v1293_v27 = vpop.f32.mrb[7].mxu1  ;;  %v1313_v28 = vpop.f32.mrb[11].mxu0 }
 0x271   : > { %v842_v29 = vld [vmem:[#allocation2 + $0x1] sm:$0xff]  ;;  %v843_v30 = vld [vmem:[#allocation2 + $0x9] sm:$0x7f] }
 0x272   : > { %v844_v31 = vadd.f32 %v842_v29, %v835_v22  ;;  %v845_v32 = vadd.f32 %v843_v30, %v838_v26 }
 0x274   : > { %846 = vst [vmem:[#allocation2 + $0x1] sm:$0xff] %v844_v31  ;;  %847 = vst [vmem:[#allocation2 + $0x9] sm:$0x7f] %v845_v32 }
 0x27b   : > { %v955_v38 = vld [vmem:[#allocation2 + $0x8] sm:$0x7f]  ;;  %v954_v39 = vld [vmem:[#allocation2] sm:$0xff] }
 0x287   : > { %v947_v33 = vpop.f32.mrb[8].mxu1 }
 0x288   : > { %v1332_v0 = vpop.f32.mrb[9].mxu1  ;;  %v958_v35 = vrot.slane %v947_v33, 1 }
 0x289   : > { %v950_v34 = vpop.f32.mrb[10].mxu1 }
 0x28a   : > { %v959_v36 = vrot.slane %v950_v34, 1  ;;  %v1333_v37 = vpop.f32.mrb[11].mxu1 }
 0x28c   : > { %v960_v40 = vsel %vm605_vm1, %v958_v35, %v959_v36  ;;  %v964_v41 = vadd.f32 %v959_v36, %v955_v38 }
 0x28d   : > { %v963_v43 = vadd.f32 %v960_v40, %v954_v39 }
 0x28e   : > { %966 = vst [vmem:[#allocation2 + $0x8] sm:$0x7f] %v964_v41 }
 0x28f   : > { %965 = vst [vmem:[#allocation2] sm:$0xff] %v963_v43  ;;  %v976_v44 = vadd.f32 %v1152_v42, %v963_v43 }
 0x291   : > { %v978_v45 = vadd.f32 %v976_v44, %v1863_v15 }
 0x293   : > { %v980_v46 = vmax.f32 %v978_v45, 0.0 }
 0x295   : > { %v968_v47 = vld [vmem:[#allocation2 + $0x8] sm:$0xff]  ;;  %982 = vst [vmem:[%s271_s11] sm:$0xff] %v980_v46 }
 0x296   : > { %v977_v48 = vadd.f32 %v1152_v42, %v968_v47 }
 0x298   : > { %v979_v49 = vadd.f32 %v977_v48, %v1866_v16 }
 0x29a   : > { %v981_v15 = vmax.f32 %v979_v49, 0.0 }
 0x29c   : > { %983 = vst [vmem:[%s271_s11 + $0x8] sm:$0xff] %v981_v15 }
 0x29d   : > { %1556 = shalt.err (!%p1553_p2)
}
 0x29e   : > { %s1557_s6 = scalar_lea.hbm %s1929_s9, 256  ;;  %s1561_s8 = scalar_lea.hbm %s1980_s5, 512 }
 0x29f   : > { %p1558_p13 = scmp.ne.s32.totalorder %s1929_s9, %s1557_s6  ;;  %p1562_p4 = scmp.lt.u32.totalorder %s1929_s9, %s1980_s5 }
 0x2a0   : > { %p1563_p5 = scmp.lt.u32.totalorder %s1561_s8, %s1557_s6  ;;  %p1565_p11 = scmp.lt.u32.totalorder %s1557_s6, %s1929_s9 }
 0x2a1   : > { %p1559_p6 = pnand %p1558_p13, %p1994_p0 }
 0x2a2   : > { %p1564_p8 = por %p1563_p5, %p1562_p4 }
 0x2a3   : > { %p1560_p10 = pneg %p1559_p6 }
 0x2a4   : > { %p1566_p1 = por %p1565_p11, %p1564_p8 }
 0x2a6   : > { %p1567_p3 = pnand %p1566_p1, %p1560_p10 }
 0x2a8   : > { %1570 = shalt.err (!%p1567_p3)
}
 0x2a9   : > { %s1625_s28 = smov 128   ;;  %s1626_s15 = smov 8  }
 0x2aa   : > { %1344 = dma.vmem_to_hbm [thread:$0]  (%p1994_p0), %s1931_s30, 256, %s1929_s9, %s985_s12, %s1625_s28, %s1625_s28, %s1626_s15  }
 0x2ab PF: > { %s1013_s16 = sand.u32 1, %s1601_s18   ;;  %p1995_p7 = scmp.ne.s32.totalorder %s1985_s25, 0 }
 0x2ac   : > { %p1996_p9 = scmp.ge.s32.totalorder %s1613_s21, 2  ;;  %s1014_s13 = scalar_lea.sflag [#allocation5], %s1013_s16 }
 0x2ae   : > { %p1358_p12 = pnand %p1996_p9, %p1995_p7 }
 0x2b0   : > { %1596 = dma.done.wait (!%p1358_p12), %s1014_s13, 256  }
 0x2b1   : > { %1598 = vsyncadd (!%p1358_p12), %s1014_s13, 4294967040  ;;  %p19_p2 = scmp.ge.s32.totalorder %s1767_s14, 4   ;;  %s1997_s18 = smov %s1605_s19 }
 0x2b2   : > { %s1998_s19 = smov %s1609_s20  ;;  %s1999_s20 = smov %s1783_s27 }
 0x2b3   : > { %s2000_s21 = smov %s1767_s14  ;;  %21 = sbr.rel (!%p19_p2) target bundleno = 6 (0x6), region = 97 }
 0x2ba   :  { %1019 = vsyncpa [#allocation4], 1 }
 0x2bb   :  { %1021 = vsyncpa [#allocation4 + $0x1], 1 }
 0x2bc   :  { %1022 = vsyncpa [#allocation7], 1 }
 0x2bd   :  { %1023 = vsyncpa [#allocation5], 1 }
 0x2be   :  { %1025 = vsyncpa [#allocation5 + $0x1], 1 }

</bundles_post_ra>
